<compile_context>
chip_gen: v6e
topology: v6e:2x2x1
jax: 0.10.0
libtpu: 0.0.40
codegen_flags: <defaults>
</compile_context>

<pallas_src>
import functools

import jax
import jax.numpy as jnp
from jax import lax
from jax.experimental import pallas as pl
from jax.experimental.pallas import tpu as pltpu


def _round_up(x, m):
    return (x + m - 1) // m * m


# ---------------------------------------------------------------------------
# In-kernel helpers
# ---------------------------------------------------------------------------
def _stage_taps(x, mask_ref, slab_ref, *, W, dilation, L):
    """im2col staging: write the 9 rolled+masked taps of x (C, L) into slab_ref (9*C, L).

    x        : (C, L) f32 activations, spatial (+batch) on lanes, channels on sublanes
    mask_ref : (9, C, L) f32 boundary-validity masks (pre-broadcast host-side)
    slab_ref : (9*C, L) f32 VMEM scratch — tap t occupies rows [t*C, (t+1)*C)
    """
    C = x.shape[0]
    for kh in range(3):
        dy = (kh - 1) * dilation
        for kw in range(3):
            dx = (kw - 1) * dilation
            t = kh * 3 + kw
            off = dy * W + dx
            if off == 0:
                tap = x                                   # center tap: no shift, always valid
            else:
                # tap[c, p] = x[c, p + off] when the tap stays inside its image, else 0.
                # Valid taps never cross an image boundary, so the roll over the whole
                # batch-folded lane axis is safe; invalid taps are zeroed by the mask.
                tap = pltpu.roll(x, (-off) % L, axis=1) * mask_ref[t]
            slab_ref[t * C:(t + 1) * C, :] = tap          # static, tile-aligned store


# ---------------------------------------------------------------------------
# Fused kernel body (one grid step == one chunk of images, folded onto lanes)
# ---------------------------------------------------------------------------
def _ctx_block_kernel(x_ref, w1_ref, s1_ref, b1_ref, m1_ref,
                      w2_ref, s2_ref, b2_ref, m2_ref, *rest,
                      W, dilation, cdtype, has_shortcut):
    if has_shortcut:
        ss_ref, bs_ref, o_ref, slab1, slab2 = rest
    else:
        o_ref, slab1, slab2 = rest
    Cp, L = o_ref.shape
    x = x_ref[...]                                                    # (Cinp, L) f32

    # ---- conv1 (3x3, d=1) [+ fused 1x1 shortcut rows]: one MXU matmul ----
    _stage_taps(x, m1_ref, slab1, W=W, dilation=1, L=L)
    acc = jnp.dot(w1_ref[...], slab1[...].astype(cdtype),
                  preferred_element_type=jnp.float32)                 # (Cp or 2*Cp, L)
    h = jnp.maximum(acc[:Cp] * s1_ref[...] + b1_ref[...], 0.0)        # BN + ReLU (f32 VPU)
    if has_shortcut:
        res = acc[Cp:] * ss_ref[...] + bs_ref[...]                    # 1x1 conv + BN (fused rows)
    else:
        res = x                                                       # identity shortcut (exact)

    # ---- dilated conv2 (3x3) + BN + residual add + final ReLU ----
    _stage_taps(h, m2_ref, slab2, W=W, dilation=dilation, L=L)
    acc2 = jnp.dot(w2_ref[...], slab2[...].astype(cdtype),
                   preferred_element_type=jnp.float32)                # (Cp, L)
    o_ref[...] = jnp.maximum(acc2 * s2_ref[...] + b2_ref[...] + res, 0.0)


# ---------------------------------------------------------------------------
# One-time host-side preparation (hoisted out of the per-forward path)
# ---------------------------------------------------------------------------
def prepare_context_extractor(params, *, H, W, dilation, images_per_step,
                              compute_dtype=jnp.bfloat16):
    """Precompute kernel-ready operands: folded-BN vectors, lane-dense im2col weights,
    batch-tiled boundary masks. Call once per model / input geometry."""
    Cin, Cout = params["w1"].shape[2], params["w1"].shape[3]
    Cinp, Cp = _round_up(Cin, 8), _round_up(Cout, 8)
    has_shortcut = "ws" in params
    if not has_shortcut:
        assert Cin == Cout, "identity shortcut requires in_channels == out_channels"
    nb = images_per_step
    HW = H * W
    L = nb * HW
    assert HW % 128 == 0, "keep H*W a multiple of 128 for unmasked lane-dense stores"

    def conv_w(whwio, cin, cinp):
        # HWIO (3,3,cin,cout) -> lane-dense (Cp, 9*cinp): [co, t*cinp+ci] = w[t, co, ci]
        cout = whwio.shape[3]
        w = jnp.transpose(whwio, (0, 1, 3, 2)).reshape(9, cout, cin)
        w = jnp.pad(w, ((0, 0), (0, Cp - cout), (0, cinp - cin)))
        return jnp.transpose(w, (1, 0, 2)).reshape(Cp, 9 * cinp).astype(jnp.float32)

    w1 = conv_w(params["w1"], Cin, Cinp)
    w2 = conv_w(params["w2"], Cout, Cp)
    if has_shortcut:
        # Fuse the 1x1 shortcut as extra output rows of the conv1 matmul: the shortcut only
        # sees the (unmasked) center tap, i.e. slab columns [4*Cinp, 5*Cinp).
        ws = jnp.pad(params["ws"].T.astype(jnp.float32),
                     ((0, Cp - Cout), (0, Cinp - Cin)))               # (Cp, Cinp)
        wsf = jnp.zeros((Cp, 9 * Cinp), jnp.float32).at[:, 4 * Cinp:5 * Cinp].set(ws)
        w1 = jnp.concatenate([w1, wsf], axis=0)                       # (2*Cp, 9*Cinp)

    def tap_masks(d, crows):
        p = jnp.arange(HW, dtype=jnp.int32)
        r, c = p // W, p % W
        ms = []
        for kh in range(3):
            for kw in range(3):
                dy, dx = (kh - 1) * d, (kw - 1) * d
                ms.append((r + dy >= 0) & (r + dy < H) & (c + dx >= 0) & (c + dx < W))
        m = jnp.stack(ms).astype(jnp.float32)                         # (9, HW)
        m = jnp.tile(m, (1, nb))                                      # (9, L): batch folded on lanes
        # Pre-broadcast over channel sublanes (free under the 8-sublane VMEM pad).
        # TODO(synk): for large channel counts keep (9,1,L) or fold masks into the staging write.
        return jnp.broadcast_to(m[:, None, :], (9, crows, L))

    def col(v):
        v = jnp.asarray(v, jnp.float32).reshape(-1, 1)
        return jnp.pad(v, ((0, Cp - v.shape[0]), (0, 0)))

    ops = dict(
        w1=w1.astype(compute_dtype), w2=w2.astype(compute_dtype),    # bf16 MXU operands (v6e/v7x)
        s1=col(params["scale1"]), b1=col(params["bias1"]),
        s2=col(params["scale2"]), b2=col(params["bias2"]),
        m1=tap_masks(1, Cinp), m2=tap_masks(dilation, Cp),
    )
    if has_shortcut:
        ops["ss"] = col(params["scale_s"])
        ops["bs"] = col(params["bias_s"])
    meta = dict(H=H, W=W, dilation=dilation, nb=nb, Cin=Cin, Cout=Cout,
                Cinp=Cinp, Cp=Cp, has_shortcut=has_shortcut, compute_dtype=compute_dtype)
    return ops, meta


# ---------------------------------------------------------------------------
# Forward (NCHW in / NCHW out), same semantics as the PyTorch module (eval-mode BN)
# ---------------------------------------------------------------------------
def context_extractor(x_nchw, ops, meta):
    H, W, nb = meta["H"], meta["W"], meta["nb"]
    Cin, Cout, Cinp, Cp = meta["Cin"], meta["Cout"], meta["Cinp"], meta["Cp"]
    dilation, has_shortcut, cdtype = meta["dilation"], meta["has_shortcut"], meta["compute_dtype"]
    N = x_nchw.shape[0]
    assert x_nchw.shape == (N, Cin, H, W) and N % nb == 0
    HW = H * W
    L = nb * HW                                                       # lanes per grid step

    # Lane-dense, batch-folded layout: (Cinp, N*HW).
    x = jnp.transpose(x_nchw, (1, 0, 2, 3)).reshape(Cin, N * HW).astype(jnp.float32)
    if Cinp != Cin:
        x = jnp.pad(x, ((0, Cinp - Cin), (0, 0)))

    const2 = lambda b: (0, 0)
    const3 = lambda b: (0, 0, 0)
    w1_rows = 2 * Cp if has_shortcut else Cp
    in_specs = [
        pl.BlockSpec((Cinp, L), lambda b: (0, b)),
        pl.BlockSpec((w1_rows, 9 * Cinp), const2),
        pl.BlockSpec((Cp, 1), const2),
        pl.BlockSpec((Cp, 1), const2),
        pl.BlockSpec((9, Cinp, L), const3),
        pl.BlockSpec((Cp, 9 * Cp), const2),
        pl.BlockSpec((Cp, 1), const2),
        pl.BlockSpec((Cp, 1), const2),
        pl.BlockSpec((9, Cp, L), const3),
    ]
    args = [x, ops["w1"], ops["s1"], ops["b1"], ops["m1"],
            ops["w2"], ops["s2"], ops["b2"], ops["m2"]]
    if has_shortcut:
        in_specs += [pl.BlockSpec((Cp, 1), const2), pl.BlockSpec((Cp, 1), const2)]
        args += [ops["ss"], ops["bs"]]

    kernel = functools.partial(_ctx_block_kernel, W=W, dilation=dilation,
                               cdtype=cdtype, has_shortcut=has_shortcut)
    out = pl.pallas_call(
        kernel,
        out_shape=jax.ShapeDtypeStruct((Cp, N * HW), jnp.float32),
        grid=(N // nb,),
        in_specs=in_specs,
        out_specs=pl.BlockSpec((Cp, L), lambda b: (0, b)),
        scratch_shapes=[pltpu.VMEM((9 * Cinp, L), jnp.float32),       # im2col slab, conv1
                        pltpu.VMEM((9 * Cp, L), jnp.float32)],        # im2col slab, conv2
        compiler_params=pltpu.CompilerParams(dimension_semantics=("parallel",)),
    )(*args)
    out = out[:Cout].reshape(Cout, N, H, W)
    return jnp.transpose(out, (1, 0, 2, 3))


# ---------------------------------------------------------------------------
# Deterministic parameter construction (shapes from the module's __init__)
# ---------------------------------------------------------------------------
def make_params(key, cin, cout, eps=1e-5):
    ks = jax.random.split(key, 20)

    def bn(k_idx):
        gamma = 1.0 + 0.1 * jax.random.normal(ks[k_idx], (cout,))
        beta = 0.1 * jax.random.normal(ks[k_idx + 1], (cout,))
        mean = 0.1 * jax.random.normal(ks[k_idx + 2], (cout,))
        var = jax.random.uniform(ks[k_idx + 3], (cout,), minval=0.5, maxval=1.5)
        scale = gamma / jnp.sqrt(var + eps)
        return scale, beta, mean

    p = {}
    # conv1: Conv2d(cin, cout, 3, padding=1) -> HWIO weights; conv bias folded into BN bias
    p["w1"] = 0.1 * jax.random.normal(ks[0], (3, 3, cin, cout), jnp.float32)
    b1 = 0.1 * jax.random.normal(ks[1], (cout,), jnp.float32)
    s1, be1, m1 = bn(2)
    p["scale1"] = s1
    p["bias1"] = (b1 - m1) * s1 + be1

    # conv2: Conv2d(cout, cout, 3, padding=dilation, dilation=dilation)
    p["w2"] = 0.1 * jax.random.normal(ks[6], (3, 3, cout, cout), jnp.float32)
    b2 = 0.1 * jax.random.normal(ks[7], (cout,), jnp.float32)
    s2, be2, m2 = bn(8)
    p["scale2"] = s2
    p["bias2"] = (b2 - m2) * s2 + be2

    # shortcut: Conv2d(cin, cout, 1, bias=False) + BN (only when cin != cout)
    if cin != cout:
        p["ws"] = 0.1 * jax.random.normal(ks[12], (cin, cout), jnp.float32)
        ss, bes, ms = bn(13)
        p["scale_s"] = ss
        p["bias_s"] = bes - ms * ss
    return p


# ---------------------------------------------------------------------------
# Pure-JAX reference (correctness check)
# ---------------------------------------------------------------------------
def reference_forward(x_nchw, p, dilation):
    x = jnp.transpose(x_nchw, (0, 2, 3, 1)).astype(jnp.float32)

    def conv(inp, w, d):
        return lax.conv_general_dilated(
            inp, w, window_strides=(1, 1), padding=[(d, d), (d, d)],
            rhs_dilation=(d, d), dimension_numbers=("NHWC", "HWIO", "NHWC"))

    if "ws" in p:
        w1x1 = p["ws"].reshape(1, 1, *p["ws"].shape)
        res = lax.conv_general_dilated(
            x, w1x1, (1, 1), [(0, 0), (0, 0)],
            dimension_numbers=("NHWC", "HWIO", "NHWC")) * p["scale_s"] + p["bias_s"]
    else:
        res = x
    h = jnp.maximum(conv(x, p["w1"], 1) * p["scale1"] + p["bias1"], 0.0)
    y = conv(h, p["w2"], dilation) * p["scale2"] + p["bias2"]
    out = jnp.maximum(y + res, 0.0)
    return jnp.transpose(out, (0, 3, 1, 2))


# ---------------------------------------------------------------------------
if __name__ == "__main__":
    N, CIN, COUT, H, W = 2, 4, 8, 16, 16
    DILATION = 2

    key = jax.random.PRNGKey(0)
    kx, kp, kx2, kp2 = jax.random.split(key, 4)

    # --- path 1: in_channels != out_channels (1x1-conv+BN shortcut fused into conv1), bf16 MXU
    x = jax.random.normal(kx, (N, CIN, H, W), jnp.float32)
    params = make_params(kp, CIN, COUT)
    ops, meta = prepare_context_extractor(params, H=H, W=W, dilation=DILATION,
                                          images_per_step=N, compute_dtype=jnp.bfloat16)
    out = jax.block_until_ready(context_extractor(x, ops, meta))
    ref = jax.block_until_ready(reference_forward(x, params, DILATION))
    assert out.shape == (N, COUT, H, W)
    assert jnp.allclose(out, ref, atol=3e-2, rtol=3e-2), "mismatch (shortcut path, bf16 MXU)"

    # --- path 2: in_channels == out_channels (identity shortcut), bf16 MXU
    x2 = jax.random.normal(kx2, (N, COUT, H, W), jnp.float32)
    params2 = make_params(kp2, COUT, COUT)
    ops2, meta2 = prepare_context_extractor(params2, H=H, W=W, dilation=DILATION,
                                            images_per_step=N, compute_dtype=jnp.bfloat16)
    out2 = jax.block_until_ready(context_extractor(x2, ops2, meta2))
    ref2 = jax.block_until_ready(reference_forward(x2, params2, DILATION))
    assert jnp.allclose(out2, ref2, atol=3e-2, rtol=3e-2), "mismatch (identity path, bf16 MXU)"

    # --- f32 MXU operands (v5e-friendly knob / tighter numerical parity)
    ops3, meta3 = prepare_context_extractor(params, H=H, W=W, dilation=DILATION,
                                            images_per_step=N, compute_dtype=jnp.float32)
    out3 = jax.block_until_ready(context_extractor(x, ops3, meta3))
    assert jnp.allclose(out3, ref, atol=2e-3, rtol=2e-3), "mismatch (shortcut path, f32 MXU)"

    print("KERNEL_OK")
</pallas_src>

<mosaic_0001>
module attributes {stable_mosaic.version = 11 : i64} {
  func.func @_ctx_block_kernel(%arg0: i32, %arg1: memref<8x512xf32, #tpu.memory_space<vmem>>, %arg2: memref<16x72xbf16, #tpu.memory_space<vmem>>, %arg3: memref<8x1xf32, #tpu.memory_space<vmem>>, %arg4: memref<8x1xf32, #tpu.memory_space<vmem>>, %arg5: memref<9x8x512xf32, #tpu.memory_space<vmem>>, %arg6: memref<8x72xbf16, #tpu.memory_space<vmem>>, %arg7: memref<8x1xf32, #tpu.memory_space<vmem>>, %arg8: memref<8x1xf32, #tpu.memory_space<vmem>>, %arg9: memref<9x8x512xf32, #tpu.memory_space<vmem>>, %arg10: memref<8x1xf32, #tpu.memory_space<vmem>>, %arg11: memref<8x1xf32, #tpu.memory_space<vmem>>, %arg12: memref<8x512xf32, #tpu.memory_space<vmem>>, %arg13: memref<72x512xf32, #tpu.memory_space<vmem>>, %arg14: memref<72x512xf32, #tpu.memory_space<vmem>>) attributes {dimension_semantics = [#tpu.dimension_semantics<parallel>], iteration_bounds = array<i64: 1>, scalar_prefetch = 0 : i64, scratch_operands = 2 : i64, tpu.core_type = #tpu.core_type<tc>, window_params = [{transform_indices = @transform_0, window_bounds = array<i64: 8, 512>}, {pipeline_mode = #tpu.pipeline_mode<synchronous>, transform_indices = @transform_1, window_bounds = array<i64: 16, 72>}, {pipeline_mode = #tpu.pipeline_mode<synchronous>, transform_indices = @transform_2, window_bounds = array<i64: 8, 1>}, {pipeline_mode = #tpu.pipeline_mode<synchronous>, transform_indices = @transform_3, window_bounds = array<i64: 8, 1>}, {pipeline_mode = #tpu.pipeline_mode<synchronous>, transform_indices = @transform_4, window_bounds = array<i64: 9, 8, 512>}, {pipeline_mode = #tpu.pipeline_mode<synchronous>, transform_indices = @transform_5, window_bounds = array<i64: 8, 72>}, {pipeline_mode = #tpu.pipeline_mode<synchronous>, transform_indices = @transform_6, window_bounds = array<i64: 8, 1>}, {pipeline_mode = #tpu.pipeline_mode<synchronous>, transform_indices = @transform_7, window_bounds = array<i64: 8, 1>}, {pipeline_mode = #tpu.pipeline_mode<synchronous>, transform_indices = @transform_8, window_bounds = array<i64: 9, 8, 512>}, {pipeline_mode = #tpu.pipeline_mode<synchronous>, transform_indices = @transform_9, window_bounds = array<i64: 8, 1>}, {pipeline_mode = #tpu.pipeline_mode<synchronous>, transform_indices = @transform_10, window_bounds = array<i64: 8, 1>}, {transform_indices = @transform_11, window_bounds = array<i64: 8, 512>}]} {
    %c0 = arith.constant 0 : index
    %c0_0 = arith.constant 0 : index
    %0 = vector.load %arg1[%c0, %c0_0] : memref<8x512xf32, #tpu.memory_space<vmem>>, vector<8x512xf32>
    %c17_i32 = arith.constant 17 : i32
    %1 = tpu.dynamic_rotate %0 by %c17_i32 dim 1 : vector<8x512xf32>, i32 -> vector<8x512xf32>
    %c0_1 = arith.constant 0 : index
    %c0_2 = arith.constant 0 : index
    %c0_3 = arith.constant 0 : index
    %2 = vector.load %arg5[%c0_1, %c0_2, %c0_3] : memref<9x8x512xf32, #tpu.memory_space<vmem>>, vector<1x8x512xf32>
    %3 = vector.shape_cast %2 : vector<1x8x512xf32> to vector<8x512xf32>
    %4 = arith.mulf %1, %3 : vector<8x512xf32>
    %c0_4 = arith.constant 0 : index
    %c0_5 = arith.constant 0 : index
    %5 = vector.load %arg13[%c0_4, %c0_5] : memref<72x512xf32, #tpu.memory_space<vmem>>, vector<8x512xf32>
    tpu.vector_store %arg13[%c0_4, %c0_5], %4 {strides = array<i32>} : memref<72x512xf32, #tpu.memory_space<vmem>>, vector<8x512xf32>,
    %c16_i32 = arith.constant 16 : i32
    %6 = tpu.dynamic_rotate %0 by %c16_i32 dim 1 : vector<8x512xf32>, i32 -> vector<8x512xf32>
    %c1 = arith.constant 1 : index
    %c0_6 = arith.constant 0 : index
    %c0_7 = arith.constant 0 : index
    %7 = vector.load %arg5[%c1, %c0_6, %c0_7] : memref<9x8x512xf32, #tpu.memory_space<vmem>>, vector<1x8x512xf32>
    %8 = vector.shape_cast %7 : vector<1x8x512xf32> to vector<8x512xf32>
    %9 = arith.mulf %6, %8 : vector<8x512xf32>
    %c8 = arith.constant 8 : index
    %c0_8 = arith.constant 0 : index
    %10 = vector.load %arg13[%c8, %c0_8] : memref<72x512xf32, #tpu.memory_space<vmem>>, vector<8x512xf32>
    tpu.vector_store %arg13[%c8, %c0_8], %9 {strides = array<i32>} : memref<72x512xf32, #tpu.memory_space<vmem>>, vector<8x512xf32>,
    %c15_i32 = arith.constant 15 : i32
    %11 = tpu.dynamic_rotate %0 by %c15_i32 dim 1 : vector<8x512xf32>, i32 -> vector<8x512xf32>
    %c2 = arith.constant 2 : index
    %c0_9 = arith.constant 0 : index
    %c0_10 = arith.constant 0 : index
    %12 = vector.load %arg5[%c2, %c0_9, %c0_10] : memref<9x8x512xf32, #tpu.memory_space<vmem>>, vector<1x8x512xf32>
    %13 = vector.shape_cast %12 : vector<1x8x512xf32> to vector<8x512xf32>
    %14 = arith.mulf %11, %13 : vector<8x512xf32>
    %c16 = arith.constant 16 : index
    %c0_11 = arith.constant 0 : index
    %15 = vector.load %arg13[%c16, %c0_11] : memref<72x512xf32, #tpu.memory_space<vmem>>, vector<8x512xf32>
    tpu.vector_store %arg13[%c16, %c0_11], %14 {strides = array<i32>} : memref<72x512xf32, #tpu.memory_space<vmem>>, vector<8x512xf32>,
    %c1_i32 = arith.constant 1 : i32
    %16 = tpu.dynamic_rotate %0 by %c1_i32 dim 1 : vector<8x512xf32>, i32 -> vector<8x512xf32>
    %c3 = arith.constant 3 : index
    %c0_12 = arith.constant 0 : index
    %c0_13 = arith.constant 0 : index
    %17 = vector.load %arg5[%c3, %c0_12, %c0_13] : memref<9x8x512xf32, #tpu.memory_space<vmem>>, vector<1x8x512xf32>
    %18 = vector.shape_cast %17 : vector<1x8x512xf32> to vector<8x512xf32>
    %19 = arith.mulf %16, %18 : vector<8x512xf32>
    %c24 = arith.constant 24 : index
    %c0_14 = arith.constant 0 : index
    %20 = vector.load %arg13[%c24, %c0_14] : memref<72x512xf32, #tpu.memory_space<vmem>>, vector<8x512xf32>
    tpu.vector_store %arg13[%c24, %c0_14], %19 {strides = array<i32>} : memref<72x512xf32, #tpu.memory_space<vmem>>, vector<8x512xf32>,
    %c32 = arith.constant 32 : index
    %c0_15 = arith.constant 0 : index
    %21 = vector.load %arg13[%c32, %c0_15] : memref<72x512xf32, #tpu.memory_space<vmem>>, vector<8x512xf32>
    tpu.vector_store %arg13[%c32, %c0_15], %0 {strides = array<i32>} : memref<72x512xf32, #tpu.memory_space<vmem>>, vector<8x512xf32>,
    %c511_i32 = arith.constant 511 : i32
    %22 = tpu.dynamic_rotate %0 by %c511_i32 dim 1 : vector<8x512xf32>, i32 -> vector<8x512xf32>
    %c5 = arith.constant 5 : index
    %c0_16 = arith.constant 0 : index
    %c0_17 = arith.constant 0 : index
    %23 = vector.load %arg5[%c5, %c0_16, %c0_17] : memref<9x8x512xf32, #tpu.memory_space<vmem>>, vector<1x8x512xf32>
    %24 = vector.shape_cast %23 : vector<1x8x512xf32> to vector<8x512xf32>
    %25 = arith.mulf %22, %24 : vector<8x512xf32>
    %c40 = arith.constant 40 : index
    %c0_18 = arith.constant 0 : index
    %26 = vector.load %arg13[%c40, %c0_18] : memref<72x512xf32, #tpu.memory_space<vmem>>, vector<8x512xf32>
    tpu.vector_store %arg13[%c40, %c0_18], %25 {strides = array<i32>} : memref<72x512xf32, #tpu.memory_space<vmem>>, vector<8x512xf32>,
    %c497_i32 = arith.constant 497 : i32
    %27 = tpu.dynamic_rotate %0 by %c497_i32 dim 1 : vector<8x512xf32>, i32 -> vector<8x512xf32>
    %c6 = arith.constant 6 : index
    %c0_19 = arith.constant 0 : index
    %c0_20 = arith.constant 0 : index
    %28 = vector.load %arg5[%c6, %c0_19, %c0_20] : memref<9x8x512xf32, #tpu.memory_space<vmem>>, vector<1x8x512xf32>
    %29 = vector.shape_cast %28 : vector<1x8x512xf32> to vector<8x512xf32>
    %30 = arith.mulf %27, %29 : vector<8x512xf32>
    %c48 = arith.constant 48 : index
    %c0_21 = arith.constant 0 : index
    %31 = vector.load %arg13[%c48, %c0_21] : memref<72x512xf32, #tpu.memory_space<vmem>>, vector<8x512xf32>
    tpu.vector_store %arg13[%c48, %c0_21], %30 {strides = array<i32>} : memref<72x512xf32, #tpu.memory_space<vmem>>, vector<8x512xf32>,
    %c496_i32 = arith.constant 496 : i32
    %32 = tpu.dynamic_rotate %0 by %c496_i32 dim 1 : vector<8x512xf32>, i32 -> vector<8x512xf32>
    %c7 = arith.constant 7 : index
    %c0_22 = arith.constant 0 : index
    %c0_23 = arith.constant 0 : index
    %33 = vector.load %arg5[%c7, %c0_22, %c0_23] : memref<9x8x512xf32, #tpu.memory_space<vmem>>, vector<1x8x512xf32>
    %34 = vector.shape_cast %33 : vector<1x8x512xf32> to vector<8x512xf32>
    %35 = arith.mulf %32, %34 : vector<8x512xf32>
    %c56 = arith.constant 56 : index
    %c0_24 = arith.constant 0 : index
    %36 = vector.load %arg13[%c56, %c0_24] : memref<72x512xf32, #tpu.memory_space<vmem>>, vector<8x512xf32>
    tpu.vector_store %arg13[%c56, %c0_24], %35 {strides = array<i32>} : memref<72x512xf32, #tpu.memory_space<vmem>>, vector<8x512xf32>,
    %c495_i32 = arith.constant 495 : i32
    %37 = tpu.dynamic_rotate %0 by %c495_i32 dim 1 : vector<8x512xf32>, i32 -> vector<8x512xf32>
    %c8_25 = arith.constant 8 : index
    %c0_26 = arith.constant 0 : index
    %c0_27 = arith.constant 0 : index
    %38 = vector.load %arg5[%c8_25, %c0_26, %c0_27] : memref<9x8x512xf32, #tpu.memory_space<vmem>>, vector<1x8x512xf32>
    %39 = vector.shape_cast %38 : vector<1x8x512xf32> to vector<8x512xf32>
    %40 = arith.mulf %37, %39 : vector<8x512xf32>
    %c64 = arith.constant 64 : index
    %c0_28 = arith.constant 0 : index
    %41 = vector.load %arg13[%c64, %c0_28] : memref<72x512xf32, #tpu.memory_space<vmem>>, vector<8x512xf32>
    tpu.vector_store %arg13[%c64, %c0_28], %40 {strides = array<i32>} : memref<72x512xf32, #tpu.memory_space<vmem>>, vector<8x512xf32>,
    %c0_29 = arith.constant 0 : index
    %c0_30 = arith.constant 0 : index
    %42 = vector.load %arg2[%c0_29, %c0_30] : memref<16x72xbf16, #tpu.memory_space<vmem>>, vector<16x72xbf16>
    %c0_31 = arith.constant 0 : index
    %c0_32 = arith.constant 0 : index
    %43 = vector.load %arg13[%c0_31, %c0_32] : memref<72x512xf32, #tpu.memory_space<vmem>>, vector<72x512xf32>
    %44 = arith.truncf %43 : vector<72x512xf32> to vector<72x512xbf16>
    %cst = arith.constant dense<0.000000e+00> : vector<16x512xf32>
    %45 = tpu.matmul %42, %44, %cst {dimension_numbers = #tpu.dot_dimension_numbers<[1], [0], [0], [1], [0, 0, 1, 1], [], []>} : vector<16x72xbf16>, vector<72x512xbf16>, vector<16x512xf32> -> vector<16x512xf32>
    %46 = vector.extract_strided_slice %45 {offsets = [0, 0], sizes = [8, 512], strides = [1, 1]} : vector<16x512xf32> to vector<8x512xf32>
    %c0_33 = arith.constant 0 : index
    %c0_34 = arith.constant 0 : index
    %47 = vector.load %arg3[%c0_33, %c0_34] : memref<8x1xf32, #tpu.memory_space<vmem>>, vector<8x1xf32>
    %48 = vector.broadcast %47 : vector<8x1xf32> to vector<8x512xf32>
    %49 = arith.mulf %46, %48 : vector<8x512xf32>
    %c0_35 = arith.constant 0 : index
    %c0_36 = arith.constant 0 : index
    %50 = vector.load %arg4[%c0_35, %c0_36] : memref<8x1xf32, #tpu.memory_space<vmem>>, vector<8x1xf32>
    %51 = vector.broadcast %50 : vector<8x1xf32> to vector<8x512xf32>
    %52 = arith.addf %49, %51 : vector<8x512xf32>
    %cst_37 = arith.constant 0.000000e+00 : f32
    %53 = vector.broadcast %cst_37 : f32 to vector<8x512xf32>
    %54 = arith.maximumf %52, %53 : vector<8x512xf32>
    %55 = vector.extract_strided_slice %45 {offsets = [8, 0], sizes = [8, 512], strides = [1, 1]} : vector<16x512xf32> to vector<8x512xf32>
    %c0_38 = arith.constant 0 : index
    %c0_39 = arith.constant 0 : index
    %56 = vector.load %arg10[%c0_38, %c0_39] : memref<8x1xf32, #tpu.memory_space<vmem>>, vector<8x1xf32>
    %57 = vector.broadcast %56 : vector<8x1xf32> to vector<8x512xf32>
    %58 = arith.mulf %55, %57 : vector<8x512xf32>
    %c0_40 = arith.constant 0 : index
    %c0_41 = arith.constant 0 : index
    %59 = vector.load %arg11[%c0_40, %c0_41] : memref<8x1xf32, #tpu.memory_space<vmem>>, vector<8x1xf32>
    %60 = vector.broadcast %59 : vector<8x1xf32> to vector<8x512xf32>
    %61 = arith.addf %58, %60 : vector<8x512xf32>
    %c34_i32 = arith.constant 34 : i32
    %62 = tpu.dynamic_rotate %54 by %c34_i32 dim 1 : vector<8x512xf32>, i32 -> vector<8x512xf32>
    %c0_42 = arith.constant 0 : index
    %c0_43 = arith.constant 0 : index
    %c0_44 = arith.constant 0 : index
    %63 = vector.load %arg9[%c0_42, %c0_43, %c0_44] : memref<9x8x512xf32, #tpu.memory_space<vmem>>, vector<1x8x512xf32>
    %64 = vector.shape_cast %63 : vector<1x8x512xf32> to vector<8x512xf32>
    %65 = arith.mulf %62, %64 : vector<8x512xf32>
    %c0_45 = arith.constant 0 : index
    %c0_46 = arith.constant 0 : index
    %66 = vector.load %arg14[%c0_45, %c0_46] : memref<72x512xf32, #tpu.memory_space<vmem>>, vector<8x512xf32>
    tpu.vector_store %arg14[%c0_45, %c0_46], %65 {strides = array<i32>} : memref<72x512xf32, #tpu.memory_space<vmem>>, vector<8x512xf32>,
    %c32_i32 = arith.constant 32 : i32
    %67 = tpu.dynamic_rotate %54 by %c32_i32 dim 1 : vector<8x512xf32>, i32 -> vector<8x512xf32>
    %c1_47 = arith.constant 1 : index
    %c0_48 = arith.constant 0 : index
    %c0_49 = arith.constant 0 : index
    %68 = vector.load %arg9[%c1_47, %c0_48, %c0_49] : memref<9x8x512xf32, #tpu.memory_space<vmem>>, vector<1x8x512xf32>
    %69 = vector.shape_cast %68 : vector<1x8x512xf32> to vector<8x512xf32>
    %70 = arith.mulf %67, %69 : vector<8x512xf32>
    %c8_50 = arith.constant 8 : index
    %c0_51 = arith.constant 0 : index
    %71 = vector.load %arg14[%c8_50, %c0_51] : memref<72x512xf32, #tpu.memory_space<vmem>>, vector<8x512xf32>
    tpu.vector_store %arg14[%c8_50, %c0_51], %70 {strides = array<i32>} : memref<72x512xf32, #tpu.memory_space<vmem>>, vector<8x512xf32>,
    %c30_i32 = arith.constant 30 : i32
    %72 = tpu.dynamic_rotate %54 by %c30_i32 dim 1 : vector<8x512xf32>, i32 -> vector<8x512xf32>
    %c2_52 = arith.constant 2 : index
    %c0_53 = arith.constant 0 : index
    %c0_54 = arith.constant 0 : index
    %73 = vector.load %arg9[%c2_52, %c0_53, %c0_54] : memref<9x8x512xf32, #tpu.memory_space<vmem>>, vector<1x8x512xf32>
    %74 = vector.shape_cast %73 : vector<1x8x512xf32> to vector<8x512xf32>
    %75 = arith.mulf %72, %74 : vector<8x512xf32>
    %c16_55 = arith.constant 16 : index
    %c0_56 = arith.constant 0 : index
    %76 = vector.load %arg14[%c16_55, %c0_56] : memref<72x512xf32, #tpu.memory_space<vmem>>, vector<8x512xf32>
    tpu.vector_store %arg14[%c16_55, %c0_56], %75 {strides = array<i32>} : memref<72x512xf32, #tpu.memory_space<vmem>>, vector<8x512xf32>,
    %c2_i32 = arith.constant 2 : i32
    %77 = tpu.dynamic_rotate %54 by %c2_i32 dim 1 : vector<8x512xf32>, i32 -> vector<8x512xf32>
    %c3_57 = arith.constant 3 : index
    %c0_58 = arith.constant 0 : index
    %c0_59 = arith.constant 0 : index
    %78 = vector.load %arg9[%c3_57, %c0_58, %c0_59] : memref<9x8x512xf32, #tpu.memory_space<vmem>>, vector<1x8x512xf32>
    %79 = vector.shape_cast %78 : vector<1x8x512xf32> to vector<8x512xf32>
    %80 = arith.mulf %77, %79 : vector<8x512xf32>
    %c24_60 = arith.constant 24 : index
    %c0_61 = arith.constant 0 : index
    %81 = vector.load %arg14[%c24_60, %c0_61] : memref<72x512xf32, #tpu.memory_space<vmem>>, vector<8x512xf32>
    tpu.vector_store %arg14[%c24_60, %c0_61], %80 {strides = array<i32>} : memref<72x512xf32, #tpu.memory_space<vmem>>, vector<8x512xf32>,
    %c32_62 = arith.constant 32 : index
    %c0_63 = arith.constant 0 : index
    %82 = vector.load %arg14[%c32_62, %c0_63] : memref<72x512xf32, #tpu.memory_space<vmem>>, vector<8x512xf32>
    tpu.vector_store %arg14[%c32_62, %c0_63], %54 {strides = array<i32>} : memref<72x512xf32, #tpu.memory_space<vmem>>, vector<8x512xf32>,
    %c510_i32 = arith.constant 510 : i32
    %83 = tpu.dynamic_rotate %54 by %c510_i32 dim 1 : vector<8x512xf32>, i32 -> vector<8x512xf32>
    %c5_64 = arith.constant 5 : index
    %c0_65 = arith.constant 0 : index
    %c0_66 = arith.constant 0 : index
    %84 = vector.load %arg9[%c5_64, %c0_65, %c0_66] : memref<9x8x512xf32, #tpu.memory_space<vmem>>, vector<1x8x512xf32>
    %85 = vector.shape_cast %84 : vector<1x8x512xf32> to vector<8x512xf32>
    %86 = arith.mulf %83, %85 : vector<8x512xf32>
    %c40_67 = arith.constant 40 : index
    %c0_68 = arith.constant 0 : index
    %87 = vector.load %arg14[%c40_67, %c0_68] : memref<72x512xf32, #tpu.memory_space<vmem>>, vector<8x512xf32>
    tpu.vector_store %arg14[%c40_67, %c0_68], %86 {strides = array<i32>} : memref<72x512xf32, #tpu.memory_space<vmem>>, vector<8x512xf32>,
    %c482_i32 = arith.constant 482 : i32
    %88 = tpu.dynamic_rotate %54 by %c482_i32 dim 1 : vector<8x512xf32>, i32 -> vector<8x512xf32>
    %c6_69 = arith.constant 6 : index
    %c0_70 = arith.constant 0 : index
    %c0_71 = arith.constant 0 : index
    %89 = vector.load %arg9[%c6_69, %c0_70, %c0_71] : memref<9x8x512xf32, #tpu.memory_space<vmem>>, vector<1x8x512xf32>
    %90 = vector.shape_cast %89 : vector<1x8x512xf32> to vector<8x512xf32>
    %91 = arith.mulf %88, %90 : vector<8x512xf32>
    %c48_72 = arith.constant 48 : index
    %c0_73 = arith.constant 0 : index
    %92 = vector.load %arg14[%c48_72, %c0_73] : memref<72x512xf32, #tpu.memory_space<vmem>>, vector<8x512xf32>
    tpu.vector_store %arg14[%c48_72, %c0_73], %91 {strides = array<i32>} : memref<72x512xf32, #tpu.memory_space<vmem>>, vector<8x512xf32>,
    %c480_i32 = arith.constant 480 : i32
    %93 = tpu.dynamic_rotate %54 by %c480_i32 dim 1 : vector<8x512xf32>, i32 -> vector<8x512xf32>
    %c7_74 = arith.constant 7 : index
    %c0_75 = arith.constant 0 : index
    %c0_76 = arith.constant 0 : index
    %94 = vector.load %arg9[%c7_74, %c0_75, %c0_76] : memref<9x8x512xf32, #tpu.memory_space<vmem>>, vector<1x8x512xf32>
    %95 = vector.shape_cast %94 : vector<1x8x512xf32> to vector<8x512xf32>
    %96 = arith.mulf %93, %95 : vector<8x512xf32>
    %c56_77 = arith.constant 56 : index
    %c0_78 = arith.constant 0 : index
    %97 = vector.load %arg14[%c56_77, %c0_78] : memref<72x512xf32, #tpu.memory_space<vmem>>, vector<8x512xf32>
    tpu.vector_store %arg14[%c56_77, %c0_78], %96 {strides = array<i32>} : memref<72x512xf32, #tpu.memory_space<vmem>>, vector<8x512xf32>,
    %c478_i32 = arith.constant 478 : i32
    %98 = tpu.dynamic_rotate %54 by %c478_i32 dim 1 : vector<8x512xf32>, i32 -> vector<8x512xf32>
    %c8_79 = arith.constant 8 : index
    %c0_80 = arith.constant 0 : index
    %c0_81 = arith.constant 0 : index
    %99 = vector.load %arg9[%c8_79, %c0_80, %c0_81] : memref<9x8x512xf32, #tpu.memory_space<vmem>>, vector<1x8x512xf32>
    %100 = vector.shape_cast %99 : vector<1x8x512xf32> to vector<8x512xf32>
    %101 = arith.mulf %98, %100 : vector<8x512xf32>
    %c64_82 = arith.constant 64 : index
    %c0_83 = arith.constant 0 : index
    %102 = vector.load %arg14[%c64_82, %c0_83] : memref<72x512xf32, #tpu.memory_space<vmem>>, vector<8x512xf32>
    tpu.vector_store %arg14[%c64_82, %c0_83], %101 {strides = array<i32>} : memref<72x512xf32, #tpu.memory_space<vmem>>, vector<8x512xf32>,
    %c0_84 = arith.constant 0 : index
    %c0_85 = arith.constant 0 : index
    %103 = vector.load %arg6[%c0_84, %c0_85] : memref<8x72xbf16, #tpu.memory_space<vmem>>, vector<8x72xbf16>
    %c0_86 = arith.constant 0 : index
    %c0_87 = arith.constant 0 : index
    %104 = vector.load %arg14[%c0_86, %c0_87] : memref<72x512xf32, #tpu.memory_space<vmem>>, vector<72x512xf32>
    %105 = arith.truncf %104 : vector<72x512xf32> to vector<72x512xbf16>
    %cst_88 = arith.constant dense<0.000000e+00> : vector<8x512xf32>
    %106 = tpu.matmul %103, %105, %cst_88 {dimension_numbers = #tpu.dot_dimension_numbers<[1], [0], [0], [1], [0, 0, 1, 1], [], []>} : vector<8x72xbf16>, vector<72x512xbf16>, vector<8x512xf32> -> vector<8x512xf32>
    %c0_89 = arith.constant 0 : index
    %c0_90 = arith.constant 0 : index
    %107 = vector.load %arg7[%c0_89, %c0_90] : memref<8x1xf32, #tpu.memory_space<vmem>>, vector<8x1xf32>
    %108 = vector.broadcast %107 : vector<8x1xf32> to vector<8x512xf32>
    %109 = arith.mulf %106, %108 : vector<8x512xf32>
    %c0_91 = arith.constant 0 : index
    %c0_92 = arith.constant 0 : index
    %110 = vector.load %arg8[%c0_91, %c0_92] : memref<8x1xf32, #tpu.memory_space<vmem>>, vector<8x1xf32>
    %111 = vector.broadcast %110 : vector<8x1xf32> to vector<8x512xf32>
    %112 = arith.addf %109, %111 : vector<8x512xf32>
    %113 = arith.addf %112, %61 : vector<8x512xf32>
    %cst_93 = arith.constant 0.000000e+00 : f32
    %114 = vector.broadcast %cst_93 : f32 to vector<8x512xf32>
    %115 = arith.maximumf %113, %114 : vector<8x512xf32>
    %c0_94 = arith.constant 0 : index
    %c0_95 = arith.constant 0 : index
    %116 = vector.load %arg12[%c0_94, %c0_95] : memref<8x512xf32, #tpu.memory_space<vmem>>, vector<8x512xf32>
    tpu.vector_store %arg12[%c0_94, %c0_95], %115 {strides = array<i32>} : memref<8x512xf32, #tpu.memory_space<vmem>>, vector<8x512xf32>,
    return
  }
  func.func @transform_0(%arg0: i32) -> (i32, i32) {
    %c0_i32 = arith.constant 0 : i32
    %c0_i32_0 = arith.constant 0 : i32
    return %c0_i32, %arg0 : i32, i32
  }
  func.func @transform_1(%arg0: i32) -> (i32, i32) {
    %c0_i32 = arith.constant 0 : i32
    %c0_i32_0 = arith.constant 0 : i32
    %c0_i32_1 = arith.constant 0 : i32
    return %c0_i32, %c0_i32_0 : i32, i32
  }
  func.func @transform_2(%arg0: i32) -> (i32, i32) {
    %c0_i32 = arith.constant 0 : i32
    %c0_i32_0 = arith.constant 0 : i32
    %c0_i32_1 = arith.constant 0 : i32
    return %c0_i32, %c0_i32_0 : i32, i32
  }
  func.func @transform_3(%arg0: i32) -> (i32, i32) {
    %c0_i32 = arith.constant 0 : i32
    %c0_i32_0 = arith.constant 0 : i32
    %c0_i32_1 = arith.constant 0 : i32
    return %c0_i32, %c0_i32_0 : i32, i32
  }
  func.func @transform_4(%arg0: i32) -> (i32, i32, i32) {
    %c0_i32 = arith.constant 0 : i32
    %c0_i32_0 = arith.constant 0 : i32
    %c0_i32_1 = arith.constant 0 : i32
    %c0_i32_2 = arith.constant 0 : i32
    return %c0_i32, %c0_i32_0, %c0_i32_1 : i32, i32, i32
  }
  func.func @transform_5(%arg0: i32) -> (i32, i32) {
    %c0_i32 = arith.constant 0 : i32
    %c0_i32_0 = arith.constant 0 : i32
    %c0_i32_1 = arith.constant 0 : i32
    return %c0_i32, %c0_i32_0 : i32, i32
  }
  func.func @transform_6(%arg0: i32) -> (i32, i32) {
    %c0_i32 = arith.constant 0 : i32
    %c0_i32_0 = arith.constant 0 : i32
    %c0_i32_1 = arith.constant 0 : i32
    return %c0_i32, %c0_i32_0 : i32, i32
  }
  func.func @transform_7(%arg0: i32) -> (i32, i32) {
    %c0_i32 = arith.constant 0 : i32
    %c0_i32_0 = arith.constant 0 : i32
    %c0_i32_1 = arith.constant 0 : i32
    return %c0_i32, %c0_i32_0 : i32, i32
  }
  func.func @transform_8(%arg0: i32) -> (i32, i32, i32) {
    %c0_i32 = arith.constant 0 : i32
    %c0_i32_0 = arith.constant 0 : i32
    %c0_i32_1 = arith.constant 0 : i32
    %c0_i32_2 = arith.constant 0 : i32
    return %c0_i32, %c0_i32_0, %c0_i32_1 : i32, i32, i32
  }
  func.func @transform_9(%arg0: i32) -> (i32, i32) {
    %c0_i32 = arith.constant 0 : i32
    %c0_i32_0 = arith.constant 0 : i32
    %c0_i32_1 = arith.constant 0 : i32
    return %c0_i32, %c0_i32_0 : i32, i32
  }
  func.func @transform_10(%arg0: i32) -> (i32, i32) {
    %c0_i32 = arith.constant 0 : i32
    %c0_i32_0 = arith.constant 0 : i32
    %c0_i32_1 = arith.constant 0 : i32
    return %c0_i32, %c0_i32_0 : i32, i32
  }
  func.func @transform_11(%arg0: i32) -> (i32, i32) {
    %c0_i32 = arith.constant 0 : i32
    %c0_i32_0 = arith.constant 0 : i32
    return %c0_i32, %arg0 : i32, i32
  }
}

</mosaic_0001>

<bundles_post_ra>
// kernel: tpu_custom_call.1
= control target key start
LH: loop header
LB: loop body
LE: loop exit
PB: predicated region body
PF: predicated region fallthrough
CT: control target
= control target key end

     0   :  { %16 = vsyncpa [#allocation5], 0  ;;  %s1359_s0 = inlined_call_operand.vmem [shape: f32[8,512], index: 0, kind: input, shape index: {}]   ;;  %s1360_s1 = inlined_call_operand.vmem [shape: bf16[16,72], index: 1, kind: input, shape index: {}]   ;;  %s1361_s2 = inlined_call_operand.vmem [shape: f32[8,1], index: 2, kind: input, shape index: {}]   ;;  %s1362_s3 = inlined_call_operand.vmem [shape: f32[8,1], index: 3, kind: input, shape index: {}]   ;;  %s1363_s4 = inlined_call_operand.hbm [shape: f32[9,8,512], index: 4, kind: input, shape index: {}]   ;;  %s1364_s5 = inlined_call_operand.vmem [shape: bf16[8,72], index: 5, kind: input, shape index: {}]   ;;  %s1365_s6 = inlined_call_operand.vmem [shape: f32[8,1], index: 6, kind: input, shape index: {}]   ;;  %s1366_s7 = inlined_call_operand.vmem [shape: f32[8,1], index: 7, kind: input, shape index: {}]   ;;  %s1367_s8 = inlined_call_operand.hbm [shape: f32[9,8,512], index: 8, kind: input, shape index: {}]   ;;  %s1368_s9 = inlined_call_operand.vmem [shape: f32[8,1], index: 9, kind: input, shape index: {}]   ;;  %s1369_s10 = inlined_call_operand.vmem [shape: f32[8,1], index: 10, kind: input, shape index: {}]   ;;  %s1370_s11 = inlined_call_operand.hbm [shape: f32[8,512], index: 11, kind: output, shape index: {}]  }
   0x1   :  { %17 = vsyncpa [#allocation8], 0 }
   0x2   :  { %18 = vsyncpa [#allocation6], 0  ;;  %s1007_s17 = smov [#allocation4]  }
   0x3   :  { %s32_s18 = sshll.u32 %s1007_s17, 4  ;;  %s33_s18 = int_to_ptr.vmem [resolvable:$true] %s32_s18 }
   0x4   :  { %s949_s19 = scalar_lea.vmem %s33_s18, 4608  ;;  %p954_p1 = scmp.lt.s32.totalorder %s33_s18, %s33_s18 }
   0x5   :  { %p950_p0 = scmp.ne.s32.totalorder %s33_s18, %s949_s19  ;;  %p955_p2 = scmp.lt.s32.totalorder %s949_s19, %s949_s19 }
   0x7   :  { %p956_p3 = por %p955_p2, %p954_p1 }
   0x9   :  { %p957_p4 = pnand %p956_p3, %p950_p0 }
   0xb   :  { %960 = shalt.err (!%p957_p4)
}
   0xc   :  { %s1008_s20 = smov 512   ;;  %s1009_s21 = smov 32  }
   0xd   :  { %38 = dma.hbm_to_vmem [thread:$0]  %s1363_s4, 4608, %s33_s18, [#allocation5], %s1008_s20, %s1008_s20, %s1009_s21  }
   0xe   :  { %s1010_s24 = smov [#allocation7]  }
   0xf   :  { %s50_s25 = sshll.u32 %s1010_s24, 4  ;;  %s51_s25 = int_to_ptr.vmem [resolvable:$true] %s50_s25 }
  0x10   :  { %s969_s26 = scalar_lea.vmem %s51_s25, 4608  ;;  %p974_p6 = scmp.lt.s32.totalorder %s51_s25, %s51_s25 }
  0x11   :  { %p970_p5 = scmp.ne.s32.totalorder %s51_s25, %s969_s26  ;;  %p975_p7 = scmp.lt.s32.totalorder %s969_s26, %s969_s26 }
  0x13   :  { %p976_p8 = por %p975_p7, %p974_p6 }
  0x15   :  { %p977_p9 = pnand %p976_p8, %p970_p5 }
  0x17   :  { %980 = shalt.err (!%p977_p9)
}
  0x18   :  { %56 = dma.hbm_to_vmem [thread:$0]  %s1367_s8, 4608, %s51_s25, [#allocation8], %s1008_s20, %s1008_s20, %s1009_s21  }
  0x19   :  { %1001 = dma.done.wait [#allocation5], 4608  }
  0x1a   :  { %1002 = vsyncadd [#allocation5], 4294962688 }
  0x1b   :  { %1003 = dma.done.wait [#allocation8], 4608  }
  0x1c   :  { %1004 = vsyncadd [#allocation8], 4294962688  ;;  %v1099_v0 = vld [vmem:[%s1359_s0 + $0x10] sm:$0xff]  ;;  %v1104_v1 = vld [vmem:[%s1359_s0] sm:$0xff]  ;;  %s1011_s13 = smov 111   ;;  %s1012_s17 = smov 113   ;;  %v80_v7 = vlaneseq }
  0x1d   :  { %263 = vrot.lane.b32.xlu1 %v1099_v0, %s1011_s13  ;;  %259 = vrot.lane.b32.xlu0 %v1104_v1, %s1011_s13  ;;  %v1111_v2 = vld [vmem:[%s1359_s0 + $0x18] sm:$0xff]  ;;  %v1116_v3 = vld [vmem:[%s1359_s0 + $0x8] sm:$0xff]  ;;  %s1013_s18 = smov 112   ;;  %s1014_s0 = smov 127   ;;  %v1018_v4 = vmov 0   ;;  %v275_v11 = vld [vmem:[#allocation4 + $0x110] sm:$0xff] }
  0x1e   :  { %s1015_s19 = smov 15   ;;  %s1016_s20 = smov 1   ;;  %397 = vmatprep.mubr.bf16.mxu0 %v1018_v4  ;;  %440 = vmatprep.mubr.bf16.mxu1 %v1018_v4  ;;  %v451_v5 = vld [vmem:[%s1361_s2] sm:$0xff]  ;;  %v1158_v8 = vand.u32 127, %v80_v7  ;;  %v274_v13 = vld [vmem:[#allocation4 + $0x108] sm:$0xff]  ;;  %v276_v14 = vld [vmem:[#allocation4 + $0x118] sm:$0xff] }
  0x1f   :  { %s1017_s22 = smov 17   ;;  %938 = vset.pattern.permute.xlu0 %v1018_v4  ;;  %939 = vset.pattern.permute.xlu1 %v1018_v4  ;;  %s1019_s23 = smov 16   ;;  %v461_v6 = vld [vmem:[%s1362_s3] sm:$0xff]  ;;  %vm352_vm1 = vcmask 1043456   ;;  %v224_v37 = vld [vmem:[#allocation4 + $0xd8] sm:$0xff]  ;;  %v222_v39 = vld [vmem:[#allocation4 + $0xc8] sm:$0xff] }
  0x20   :  { %vm267_vm0 = vcmp.lt.s32.totalorder %v1158_v8, 111  ;;  %v273_v12 = vld [vmem:[#allocation4 + $0x100] sm:$0xff]  ;;  %vm241_vm2 = vcmp.lt.s32.totalorder %v1158_v8, 112  ;;  %vm215_vm3 = vcmp.lt.s32.totalorder %v1158_v8, 113  ;;  %v223_v41 = vld [vmem:[#allocation4 + $0xd0] sm:$0xff]  ;;  %v250_v45 = vld [vmem:[#allocation4 + $0xf8] sm:$0xff] }
  0x21   :  { %265 = vrot.lane.b32.xlu1 %v1111_v2, %s1011_s13  ;;  %261 = vrot.lane.b32.xlu0 %v1116_v3, %s1011_s13  ;;  %v247_v42 = vld [vmem:[#allocation4 + $0xe0] sm:$0xff]  ;;  %v248_v46 = vld [vmem:[#allocation4 + $0xe8] sm:$0xff]  ;;  %v249_v47 = vld [vmem:[#allocation4 + $0xf0] sm:$0xff]  ;;  %vm189_vm4 = vcmp.lt.s32.totalorder %v1158_v8, 127  ;;  %vm133_vm5 = vcmp.lt.s32.totalorder %v1158_v8, 15  ;;  %vm159_vm6 = vcmp.lt.s32.totalorder %v1158_v8, 1 }
  0x22   :  { %v221_v48 = vld [vmem:[#allocation4 + $0xc0] sm:$0xff]  ;;  %vm82_vm7 = vcmp.lt.s32.totalorder %v1158_v8, 17  ;;  %vm107_vm8 = vcmp.lt.s32.totalorder %v1158_v8, 16  ;;  %vm348_vm9 = vcmask 588800   ;;  %s1021_s28 = smov 98   ;;  %s1022_s4 = smov 96  }
  0x23   :  { %s1023_s29 = smov 126   ;;  %s1024_s30 = smov 30   ;;  %vm688_vm10 = vcmp.lt.s32.totalorder %v1158_v8, 94  ;;  %vm662_vm11 = vcmp.lt.s32.totalorder %v1158_v8, 96  ;;  %vm636_vm12 = vcmp.lt.s32.totalorder %v1158_v8, 98  ;;  %vm610_vm13 = vcmp.lt.s32.totalorder %v1158_v8, 126 }
  0x24   :  { %s1025_s12 = smov 2   ;;  %s1026_s13 = smov 34   ;;  %vm554_vm14 = vcmp.lt.s32.totalorder %v1158_v8, 30  ;;  %vm580_vm15 = vcmp.lt.s32.totalorder %v1158_v8, 2 }
  0x25   :  { %209 = vrot.lane.b32.xlu1 %v1116_v3, %s1012_s17  ;;  %207 = vrot.lane.b32.xlu0 %v1104_v1, %s1012_s17 }
  0x29   :  { %213 = vrot.lane.b32.xlu1 %v1111_v2, %s1012_s17  ;;  %211 = vrot.lane.b32.xlu0 %v1099_v0, %s1012_s17 }
  0x2d   :  { %235 = vrot.lane.b32.xlu1 %v1116_v3, %s1013_s18  ;;  %233 = vrot.lane.b32.xlu0 %v1104_v1, %s1013_s18 }
  0x31   :  { %239 = vrot.lane.b32.xlu1 %v1111_v2, %s1013_s18  ;;  %237 = vrot.lane.b32.xlu0 %v1099_v0, %s1013_s18 }
  0x35   :  { %183 = vrot.lane.b32.xlu1 %v1116_v3, %s1014_s0  ;;  %181 = vrot.lane.b32.xlu0 %v1104_v1, %s1014_s0 }
  0x39   :  { %187 = vrot.lane.b32.xlu1 %v1111_v2, %s1014_s0  ;;  %185 = vrot.lane.b32.xlu0 %v1099_v0, %s1014_s0 }
  0x3d   :  { %127 = vrot.lane.b32.xlu1 %v1116_v3, %s1015_s19  ;;  %125 = vrot.lane.b32.xlu0 %v1104_v1, %s1015_s19 }
  0x41   :  { %131 = vrot.lane.b32.xlu1 %v1111_v2, %s1015_s19  ;;  %129 = vrot.lane.b32.xlu0 %v1099_v0, %s1015_s19 }
  0x45   :  { %153 = vrot.lane.b32.xlu1 %v1116_v3, %s1016_s20  ;;  %151 = vrot.lane.b32.xlu0 %v1104_v1, %s1016_s20 }
  0x49   :  { %157 = vrot.lane.b32.xlu1 %v1111_v2, %s1016_s20  ;;  %155 = vrot.lane.b32.xlu0 %v1099_v0, %s1016_s20 }
  0x4d   :  { %74 = vrot.lane.b32.xlu1 %v1116_v3, %s1017_s22  ;;  %72 = vrot.lane.b32.xlu0 %v1104_v1, %s1017_s22 }
  0x51   :  { %78 = vrot.lane.b32.xlu1 %v1111_v2, %s1017_s22  ;;  %76 = vrot.lane.b32.xlu0 %v1099_v0, %s1017_s22 }
  0x55   :  { %101 = vrot.lane.b32.xlu1 %v1116_v3, %s1019_s23  ;;  %99 = vrot.lane.b32.xlu0 %v1104_v1, %s1019_s23 }
  0x59   :  { %105 = vrot.lane.b32.xlu1 %v1111_v2, %s1019_s23  ;;  %103 = vrot.lane.b32.xlu0 %v1099_v0, %s1019_s23 }
  0x5d   :  { %454 = vperm.xlu0 %938, %v451_v5   ;;  %464 = vperm.xlu1 %939, %v461_v6  }
  0x8f   :  { %v264_v9 = vpop.permute.xlu1 %263  ;;  %v260_v10 = vpop.permute.xlu0 %259 }
  0x93   :  { %v266_v15 = vpop.permute.xlu1 %265  ;;  %v262_v16 = vpop.permute.xlu0 %261 }
  0x94   :  { %v268_v17 = vsel %vm267_vm0, %v264_v9, %v266_v15  ;;  %v271_v18 = vsel %vm267_vm0, %v266_v15, %v260_v10  ;;  %v269_v19 = vsel %vm267_vm0, %v262_v16, %v264_v9  ;;  %v270_v20 = vsel %vm267_vm0, %v260_v10, %v262_v16  ;;  %v197_v15 = vld [vmem:[#allocation4 + $0xb0] sm:$0xff] }
  0x95   :  { %v279_v21 = vmul.f32 %v275_v11, %v268_v17  ;;  %v277_v22 = vmul.f32 %v273_v12, %v270_v20  ;;  %v278_v23 = vmul.f32 %v274_v13, %v269_v19  ;;  %v280_v24 = vmul.f32 %v276_v14, %v271_v18  ;;  %v195_v11 = vld [vmem:[#allocation4 + $0xa0] sm:$0xff]  ;;  %v198_v13 = vld [vmem:[#allocation4 + $0xb8] sm:$0xff]  ;;  %v196_v14 = vld [vmem:[#allocation4 + $0xa8] sm:$0xff] }
  0x96   :  { %vm503_vm0 = vcmp.lt.s32.totalorder %v1158_v8, 34 }
  0x97   :  { %v210_v25 = vpop.permute.xlu1 %209  ;;  %v208_v26 = vpop.permute.xlu0 %207  ;;  %v340_v27 = vpack.c.bf16 %v278_v23, %v278_v23  ;;  %v342_v28 = vpack.c.bf16 %v280_v24, %v280_v24  ;;  %v339_v29 = vpack.c.bf16 %v277_v22, %v277_v22  ;;  %v341_v30 = vpack.c.bf16 %v279_v21, %v279_v21 }
  0x98   :  { %v218_v49 = vsel %vm215_vm3, %v208_v26, %v210_v25 }
  0x99   :  { %909 = vmatprep.subr.msk.bf16.mxu0 %vm352_vm1, %v340_v27  ;;  %911 = vmatprep.subr.msk.bf16.mxu1 %vm352_vm1, %v342_v28  ;;  %v354_v31 = vsel %vm352_vm1, %v339_v29, 0  ;;  %v360_v32 = vsel %vm352_vm1, %v341_v30, 0  ;;  %v225_v62 = vmul.f32 %v221_v48, %v218_v49 }
  0x9a   :  { %372 = vmatpush1.bf16.msra.mxu0 %v354_v31  ;;  %415 = vmatpush1.bf16.msra.mxu1 %v360_v32 }
  0x9b   :  { %v214_v33 = vpop.permute.xlu1 %213  ;;  %v212_v34 = vpop.permute.xlu0 %211 }
  0x9c   :  { %v219_v38 = vsel %vm215_vm3, %v214_v33, %v208_v26  ;;  %v217_v40 = vsel %vm215_vm3, %v210_v25, %v212_v34  ;;  %v216_v44 = vsel %vm215_vm3, %v212_v34, %v214_v33  ;;  %v140_v33 = vld [vmem:[#allocation4 + $0x48] sm:$0xff] }
  0x9d   :  { %v228_v50 = vmul.f32 %v224_v37, %v219_v38  ;;  %v226_v51 = vmul.f32 %v222_v39, %v217_v40  ;;  %v227_v58 = vmul.f32 %v223_v41, %v216_v44  ;;  %v166_v34 = vld [vmem:[#allocation4 + $0x68] sm:$0xff]  ;;  %v141_v38 = vld [vmem:[#allocation4 + $0x50] sm:$0xff]  ;;  %v142_v39 = vld [vmem:[#allocation4 + $0x58] sm:$0xff] }
  0x9e   :  { %v167_v44 = vld [vmem:[#allocation4 + $0x70] sm:$0xff] }
  0x9f   :  { %v236_v35 = vpop.permute.xlu1 %235  ;;  %v234_v36 = vpop.permute.xlu0 %233 }
  0xa0   :  { %v244_v43 = vsel %vm241_vm2, %v234_v36, %v236_v35 }
  0xa1   :  { %v251_v54 = vmul.f32 %v247_v42, %v244_v43  ;;  %v165_v43 = vld [vmem:[#allocation4 + $0x60] sm:$0xff] }
  0xa3   :  { %v240_v52 = vpop.permute.xlu1 %239  ;;  %v238_v53 = vpop.permute.xlu0 %237  ;;  %v335_v10 = vpack.c.bf16 %v251_v54, %v225_v62 }
  0xa4   :  { %v245_v55 = vsel %vm241_vm2, %v240_v52, %v234_v36  ;;  %v242_v56 = vsel %vm241_vm2, %v238_v53, %v240_v52  ;;  %v243_v57 = vsel %vm241_vm2, %v236_v35, %v238_v53 }
  0xa5   :  { %v254_v59 = vmul.f32 %v250_v45, %v245_v55  ;;  %v252_v60 = vmul.f32 %v248_v46, %v243_v57  ;;  %v253_v61 = vmul.f32 %v249_v47, %v242_v56  ;;  %v168_v45 = vld [vmem:[#allocation4 + $0x78] sm:$0xff] }
  0xa7   :  { %v184_v63 = vpop.permute.xlu1 %183  ;;  %v182_v5 = vpop.permute.xlu0 %181  ;;  %v336_v6 = vpack.c.bf16 %v252_v60, %v226_v51  ;;  %v338_v7 = vpack.c.bf16 %v254_v59, %v228_v50  ;;  %v337_v9 = vpack.c.bf16 %v253_v61, %v227_v58 }
  0xa8   :  { %v192_v12 = vsel %vm189_vm4, %v182_v5, %v184_v63 }
  0xa9   :  { %373 = vmatprep.subr.bf16.mxu0 %v336_v6  ;;  %416 = vmatprep.subr.bf16.mxu1 %v338_v7  ;;  %v199_v18 = vmul.f32 %v195_v11, %v192_v12  ;;  %v88_v6 = vld [vmem:[#allocation4 + $0x8] sm:$0xff]  ;;  %v87_v12 = vld [vmem:[#allocation4] sm:$0xff] }
  0xaa   :  { %374 = vmatpush1.bf16.msra.mxu0 %v335_v10  ;;  %417 = vmatpush1.bf16.msra.mxu1 %v337_v9  ;;  %v114_v9 = vld [vmem:[#allocation4 + $0x28] sm:$0xff] }
  0xab   :  { %v188_v16 = vpop.permute.xlu1 %187  ;;  %v186_v17 = vpop.permute.xlu0 %185  ;;  %v331_v30 = vpack.c.bf16 %v199_v18, %v1104_v1 }
  0xac   :  { %v193_v19 = vsel %vm189_vm4, %v188_v16, %v182_v5  ;;  %v190_v20 = vsel %vm189_vm4, %v186_v17, %v188_v16  ;;  %v191_v21 = vsel %vm189_vm4, %v184_v63, %v186_v17  ;;  %v89_v16 = vld [vmem:[#allocation4 + $0x10] sm:$0xff]  ;;  %v90_v17 = vld [vmem:[#allocation4 + $0x18] sm:$0xff] }
  0xad   :  { %v202_v22 = vmul.f32 %v198_v13, %v193_v19  ;;  %v200_v23 = vmul.f32 %v196_v14, %v191_v21  ;;  %v201_v24 = vmul.f32 %v197_v15, %v190_v20  ;;  %v113_v21 = vld [vmem:[#allocation4 + $0x20] sm:$0xff] }
  0xaf   :  { %v128_v25 = vpop.permute.xlu1 %127  ;;  %v126_v26 = vpop.permute.xlu0 %125  ;;  %v332_v27 = vpack.c.bf16 %v200_v23, %v1116_v3  ;;  %v334_v28 = vpack.c.bf16 %v202_v22, %v1111_v2  ;;  %v333_v29 = vpack.c.bf16 %v201_v24, %v1099_v0  ;;  %v139_v0 = vld [vmem:[#allocation4 + $0x40] sm:$0xff]  ;;  %v115_v22 = vld [vmem:[#allocation4 + $0x30] sm:$0xff]  ;;  %v116_v23 = vld [vmem:[#allocation4 + $0x38] sm:$0xff] }
  0xb0   :  { %v136_v3 = vsel %vm133_vm5, %v126_v26, %v128_v25 }
  0xb1   :  { %375 = vmatprep.subr.bf16.mxu0 %v332_v27  ;;  %418 = vmatprep.subr.bf16.mxu1 %v334_v28  ;;  %v144_v37 = vmul.f32 %v140_v33, %v136_v3 }
  0xb2   :  { %376 = vmatpush1.bf16.msra.mxu0 %v331_v30  ;;  %419 = vmatpush1.bf16.msra.mxu1 %v333_v29 }
  0xb3   :  { %v132_v31 = vpop.permute.xlu1 %131  ;;  %v130_v32 = vpop.permute.xlu0 %129 }
  0xb4   :  { %v137_v1 = vsel %vm133_vm5, %v132_v31, %v126_v26  ;;  %v135_v40 = vsel %vm133_vm5, %v128_v25, %v130_v32  ;;  %v134_v42 = vsel %vm133_vm5, %v130_v32, %v132_v31 }
  0xb5   :  { %v143_v46 = vmul.f32 %v139_v0, %v137_v1  ;;  %v145_v50 = vmul.f32 %v141_v38, %v135_v40  ;;  %v146_v54 = vmul.f32 %v142_v39, %v134_v42  ;;  %v940_v1 = vld [vmem:[%s1360_s1] sm:$0xff]   ;;  %s1020_s1 = smov 94  }
  0xb7   :  { %v154_v2 = vpop.permute.xlu1 %153  ;;  %v152_v35 = vpop.permute.xlu0 %151 }
  0xb8   :  { %v162_v36 = vsel %vm159_vm6, %v152_v35, %v154_v2 }
  0xb9   :  { %v170_v41 = vmul.f32 %v166_v34, %v162_v36 }
  0xbb   :  { %v158_v47 = vpop.permute.xlu1 %157  ;;  %v156_v48 = vpop.permute.xlu0 %155  ;;  %v328_v49 = vpack.c.bf16 %v170_v41, %v144_v37 }
  0xbc   :  { %v163_v51 = vsel %vm159_vm6, %v158_v47, %v152_v35  ;;  %v160_v52 = vsel %vm159_vm6, %v156_v48, %v158_v47  ;;  %v161_v53 = vsel %vm159_vm6, %v154_v2, %v156_v48 }
  0xbd   :  { %v169_v55 = vmul.f32 %v165_v43, %v163_v51  ;;  %v171_v56 = vmul.f32 %v167_v44, %v161_v53  ;;  %v172_v57 = vmul.f32 %v168_v45, %v160_v52  ;;  %377 = vmatprep.subr.bf16.mxu0 %v328_v49  ;;  %v475_v53 = vld [vmem:[%s1368_s9] sm:$0xff] }
  0xbf   :  { %v75_v58 = vpop.permute.xlu1 %74  ;;  %v73_v59 = vpop.permute.xlu0 %72  ;;  %v327_v60 = vpack.c.bf16 %v169_v55, %v143_v46  ;;  %v330_v61 = vpack.c.bf16 %v172_v57, %v146_v54  ;;  %v329_v62 = vpack.c.bf16 %v171_v56, %v145_v50  ;;  %v860_v54 = vld [vmem:[%s1365_s6] sm:$0xff] }
  0xc0   :  { %v85_v7 = vsel %vm82_vm7, %v73_v59, %v75_v58  ;;  %v485_v55 = vld [vmem:[%s1369_s10] sm:$0xff] }
  0xc1   :  { %378 = vmatpush1.bf16.msra.mxu0 %v327_v60  ;;  %420 = vmatprep.subr.bf16.mxu1 %v330_v61  ;;  %v92_v15 = vmul.f32 %v88_v6, %v85_v7  ;;  %v870_v56 = vld [vmem:[%s1366_s7] sm:$0xff]  ;;  %v695_v61 = vld [vmem:[#allocation7 + $0x108] sm:$0xff]  ;;  %v696_v6 = vld [vmem:[#allocation7 + $0x110] sm:$0xff] }
  0xc2   :  { %421 = vmatpush1.bf16.msra.mxu1 %v329_v62  ;;  %v697_v7 = vld [vmem:[#allocation7 + $0x118] sm:$0xff] }
  0xc3   :  { %v79_v63 = vpop.permute.xlu1 %78  ;;  %v77_v5 = vpop.permute.xlu0 %76 }
  0xc4   :  { %v86_v13 = vsel %vm82_vm7, %v79_v63, %v73_v59  ;;  %v84_v18 = vsel %vm82_vm7, %v75_v58, %v77_v5  ;;  %v83_v20 = vsel %vm82_vm7, %v77_v5, %v79_v63  ;;  %v694_v58 = vld [vmem:[#allocation7 + $0x100] sm:$0xff] }
  0xc5   :  { %v91_v24 = vmul.f32 %v87_v12, %v86_v13  ;;  %v93_v28 = vmul.f32 %v89_v16, %v84_v18  ;;  %v94_v32 = vmul.f32 %v90_v17, %v83_v20 }
  0xc7   :  { %v102_v10 = vpop.permute.xlu1 %101  ;;  %v100_v11 = vpop.permute.xlu0 %99 }
  0xc8   :  { %v110_v14 = vsel %vm107_vm8, %v100_v11, %v102_v10 }
  0xc9   :  { %v118_v19 = vmul.f32 %v114_v9, %v110_v14 }
  0xcb   :  { %v106_v25 = vpop.permute.xlu1 %105  ;;  %v104_v26 = vpop.permute.xlu0 %103  ;;  %v324_v27 = vpack.c.bf16 %v118_v19, %v92_v15 }
  0xcc   :  { %v111_v29 = vsel %vm107_vm8, %v106_v25, %v100_v11  ;;  %v108_v30 = vsel %vm107_vm8, %v104_v26, %v106_v25  ;;  %v109_v31 = vsel %vm107_vm8, %v102_v10, %v104_v26  ;;  %v668_v26 = vld [vmem:[#allocation7 + $0xe0] sm:$0xff] }
  0xcd   :  { %v117_v33 = vmul.f32 %v113_v21, %v111_v29  ;;  %v119_v3 = vmul.f32 %v115_v22, %v109_v31  ;;  %v120_v34 = vmul.f32 %v116_v23, %v108_v30  ;;  %379 = vmatprep.subr.bf16.mxu0 %v324_v27  ;;  %v669_v31 = vld [vmem:[#allocation7 + $0xe8] sm:$0xff] }
  0xcf   :  { %v323_v2 = vpack.c.bf16 %v117_v33, %v91_v24  ;;  %v326_v35 = vpack.c.bf16 %v120_v34, %v94_v32  ;;  %v325_v0 = vpack.c.bf16 %v119_v3, %v93_v28  ;;  %v643_v28 = vld [vmem:[#allocation7 + $0xc8] sm:$0xff]  ;;  %v642_v32 = vld [vmem:[#allocation7 + $0xc0] sm:$0xff]  ;;  %v644_v3 = vld [vmem:[#allocation7 + $0xd0] sm:$0xff] }
  0xd1   :  { %380 = vmatpush1.bf16.msra.mxu0 %v323_v2  ;;  %422 = vmatprep.subr.bf16.mxu1 %v326_v35  ;;  %v645_v35 = vld [vmem:[#allocation7 + $0xd8] sm:$0xff] }
  0xd2   :  { %423 = vmatpush1.bf16.msra.mxu1 %v325_v0 }
  0xd4   :  { %910 = vmatmul.mubr.msk.bf16.vlgmr.msra.gmra.mxu0 %vm348_vm9, %v940_v1 }
  0xd5   :  { %912 = vmatmul.mubr.msk.bf16.vlgmr.msra.gmra.mxu1 %vm348_vm9, %v940_v1  ;;  %810 = vmatprep.mubr.bf16.mxu0 %v1018_v4 }
  0xd6   :  { %851 = vmatprep.mubr.bf16.mxu1 %v1018_v4 }
  0xd8   :  { %v455_v36 = vpop.permute.xlu0 %454  ;;  %v465_v38 = vpop.permute.xlu1 %464 }
 0x194   :  { %v399_v37 = vpop.f32.mrf.mxu0 }
 0x195   :  { %v457_v39 = vmul.f32 %v455_v36, %v399_v37  ;;  %v442_v40 = vpop.f32.mrf.mxu1  ;;  %v670_v37 = vld [vmem:[#allocation7 + $0xf0] sm:$0xff] }
 0x196   :  { %v459_v41 = vmul.f32 %v455_v36, %v442_v40  ;;  %v401_v42 = vpop.f32.mrf.mxu0 }
 0x197   :  { %v467_v43 = vadd.f32 %v465_v38, %v457_v39  ;;  %v458_v44 = vmul.f32 %v455_v36, %v401_v42  ;;  %v444_v45 = vpop.f32.mrf.mxu1 }
 0x198   :  { %v460_v46 = vmul.f32 %v455_v36, %v444_v45  ;;  %v469_v47 = vadd.f32 %v465_v38, %v459_v41 }
 0x199   :  { %v1231_v48 = vmax.f32 %v467_v43, 0.0  ;;  %v468_v49 = vadd.f32 %v465_v38, %v458_v44 }
 0x19a   :  { %v470_v51 = vadd.f32 %v465_v38, %v460_v46  ;;  %v1236_v4 = vmax.f32 %v469_v47, 0.0  ;;  %v671_v38 = vld [vmem:[#allocation7 + $0xf8] sm:$0xff] }
 0x19b   :  { %v1233_v50 = vmax.f32 %v468_v49, 0.0  ;;  %680 = vrot.lane.b32.xlu1 %v1231_v48, %s1020_s1 }
 0x19c   :  { %v1239_v52 = vmax.f32 %v470_v51, 0.0 }
 0x19d   :  { %682 = vrot.lane.b32.xlu0 %v1233_v50, %s1020_s1 }
 0x19f   :  { %684 = vrot.lane.b32.xlu1 %v1236_v4, %s1020_s1 }
 0x1a1   :  { %686 = vrot.lane.b32.xlu0 %v1239_v52, %s1020_s1 }
 0x1a3   :  { %628 = vrot.lane.b32.xlu1 %v1231_v48, %s1021_s28 }
 0x1a5   :  { %630 = vrot.lane.b32.xlu0 %v1233_v50, %s1021_s28 }
 0x1a7   :  { %632 = vrot.lane.b32.xlu1 %v1236_v4, %s1021_s28 }
 0x1a9   :  { %634 = vrot.lane.b32.xlu0 %v1239_v52, %s1021_s28 }
 0x1ab   :  { %654 = vrot.lane.b32.xlu1 %v1231_v48, %s1022_s4 }
 0x1ad   :  { %656 = vrot.lane.b32.xlu0 %v1233_v50, %s1022_s4 }
 0x1af   :  { %658 = vrot.lane.b32.xlu1 %v1236_v4, %s1022_s4 }
 0x1b1   :  { %660 = vrot.lane.b32.xlu0 %v1239_v52, %s1022_s4 }
 0x1b3   :  { %602 = vrot.lane.b32.xlu1 %v1231_v48, %s1023_s29 }
 0x1b5   :  { %604 = vrot.lane.b32.xlu0 %v1233_v50, %s1023_s29 }
 0x1b7   :  { %606 = vrot.lane.b32.xlu1 %v1236_v4, %s1023_s29 }
 0x1b9   :  { %608 = vrot.lane.b32.xlu0 %v1239_v52, %s1023_s29 }
 0x1bb   :  { %546 = vrot.lane.b32.xlu1 %v1231_v48, %s1024_s30 }
 0x1bd   :  { %548 = vrot.lane.b32.xlu0 %v1233_v50, %s1024_s30 }
 0x1bf   :  { %550 = vrot.lane.b32.xlu1 %v1236_v4, %s1024_s30 }
 0x1c1   :  { %552 = vrot.lane.b32.xlu0 %v1239_v52, %s1024_s30 }
 0x1c3   :  { %572 = vrot.lane.b32.xlu1 %v1231_v48, %s1025_s12 }
 0x1c5   :  { %574 = vrot.lane.b32.xlu0 %v1233_v50, %s1025_s12 }
 0x1c7   :  { %576 = vrot.lane.b32.xlu1 %v1236_v4, %s1025_s12 }
 0x1c9   :  { %578 = vrot.lane.b32.xlu0 %v1239_v52, %s1025_s12 }
 0x1cb   :  { %495 = vrot.lane.b32.xlu1 %v1231_v48, %s1026_s13 }
 0x1cd   :  { %497 = vrot.lane.b32.xlu0 %v1233_v50, %s1026_s13 }
 0x1cf   :  { %499 = vrot.lane.b32.xlu1 %v1236_v4, %s1026_s13 }
 0x1d1   :  { %501 = vrot.lane.b32.xlu0 %v1239_v52, %s1026_s13 }
 0x1d3   :  { %520 = vrot.lane.b32.xlu1 %v1231_v48, %s1009_s21 }
 0x1d5   :  { %522 = vrot.lane.b32.xlu0 %v1233_v50, %s1009_s21 }
 0x1d7   :  { %524 = vrot.lane.b32.xlu1 %v1236_v4, %s1009_s21 }
 0x1d9   :  { %526 = vrot.lane.b32.xlu0 %v1239_v52, %s1009_s21 }
 0x1db   :  { %478 = vperm.xlu1 %939, %v475_v53  }
 0x1dd   :  { %863 = vperm.xlu0 %938, %v860_v54  }
 0x1df   :  { %488 = vperm.xlu1 %939, %v485_v55  }
 0x1e1   :  { %873 = vperm.xlu0 %938, %v870_v56   ;;  %v616_v56 = vld [vmem:[#allocation7 + $0xa0] sm:$0xff] }
 0x20d   :  { %v681_v57 = vpop.permute.xlu1 %680 }
 0x20f   :  { %v683_v59 = vpop.permute.xlu0 %682 }
 0x210   :  { %v691_v60 = vsel %vm688_vm10, %v681_v57, %v683_v59 }
 0x211   :  { %v698_v62 = vmul.f32 %v694_v58, %v691_v60  ;;  %v685_v63 = vpop.permute.xlu1 %684  ;;  %v617_v60 = vld [vmem:[#allocation7 + $0xa8] sm:$0xff] }
 0x212   :  { %v690_v5 = vsel %vm688_vm10, %v683_v59, %v685_v63 }
 0x213   :  { %v759_v9 = vpack.c.bf16 %v698_v62, %v698_v62  ;;  %v699_v10 = vmul.f32 %v695_v61, %v690_v5  ;;  %v687_v11 = vpop.permute.xlu0 %686  ;;  %v618_v5 = vld [vmem:[#allocation7 + $0xb0] sm:$0xff] }
 0x214   :  { %v689_v12 = vsel %vm688_vm10, %v685_v63, %v687_v11  ;;  %v692_v13 = vsel %vm688_vm10, %v687_v11, %v681_v57 }
 0x215   :  { %v760_v14 = vpack.c.bf16 %v699_v10, %v699_v10  ;;  %v700_v15 = vmul.f32 %v696_v6, %v689_v12  ;;  %v701_v16 = vmul.f32 %v697_v7, %v692_v13  ;;  %v629_v17 = vpop.permute.xlu1 %628  ;;  %v767_v21 = vsel %vm352_vm1, %v759_v9, 0  ;;  %v619_v6 = vld [vmem:[#allocation7 + $0xb8] sm:$0xff] }
 0x217   :  { %v761_v18 = vpack.c.bf16 %v700_v15, %v700_v15  ;;  %v762_v19 = vpack.c.bf16 %v701_v16, %v701_v16  ;;  %v631_v20 = vpop.permute.xlu0 %630  ;;  %913 = vmatprep.subr.msk.bf16.mxu0 %vm352_vm1, %v760_v14 }
 0x218   :  { %785 = vmatpush1.bf16.msra.mxu0 %v767_v21  ;;  %v639_v33 = vsel %vm636_vm12, %v629_v17, %v631_v20 }
 0x219   :  { %915 = vmatprep.subr.msk.bf16.mxu1 %vm352_vm1, %v762_v19  ;;  %v633_v22 = vpop.permute.xlu1 %632  ;;  %v773_v23 = vsel %vm352_vm1, %v761_v18, 0  ;;  %v646_v42 = vmul.f32 %v642_v32, %v639_v33  ;;  %v586_v33 = vld [vmem:[#allocation7 + $0x60] sm:$0xff]  ;;  %vm528_vm1 = vcmp.lt.s32.totalorder %v1158_v8, 32  ;;  %v403_v8 = vpop.f32.mrf.mxu0 }
 0x21a   :  { %826 = vmatpush1.bf16.msra.mxu1 %v773_v23  ;;  %v638_v29 = vsel %vm636_vm12, %v631_v20, %v633_v22  ;;  %v561_v23 = vld [vmem:[#allocation7 + $0x48] sm:$0xff] }
 0x21b   :  { %v635_v24 = vpop.permute.xlu0 %634  ;;  %v647_v39 = vmul.f32 %v643_v28, %v638_v29  ;;  %v563_v29 = vld [vmem:[#allocation7 + $0x58] sm:$0xff] }
 0x21c   :  { %v637_v34 = vsel %vm636_vm12, %v633_v22, %v635_v24  ;;  %v640_v0 = vsel %vm636_vm12, %v635_v24, %v629_v17 }
 0x21d   :  { %v655_v25 = vpop.permute.xlu1 %654  ;;  %v648_v43 = vmul.f32 %v644_v3, %v637_v34  ;;  %v649_v46 = vmul.f32 %v645_v35, %v640_v0  ;;  %v589_v3 = vld [vmem:[#allocation7 + $0x78] sm:$0xff]  ;;  %v562_v34 = vld [vmem:[#allocation7 + $0x50] sm:$0xff] }
 0x21f   :  { %v657_v27 = vpop.permute.xlu0 %656 }
 0x220   :  { %v665_v30 = vsel %vm662_vm11, %v655_v25, %v657_v27 }
 0x221   :  { %v659_v2 = vpop.permute.xlu1 %658  ;;  %v672_v1 = vmul.f32 %v668_v26, %v665_v30 }
 0x222   :  { %v664_v36 = vsel %vm662_vm11, %v657_v27, %v659_v2  ;;  %v588_v27 = vld [vmem:[#allocation7 + $0x70] sm:$0xff] }
 0x223   :  { %v673_v40 = vmul.f32 %v669_v31, %v664_v36  ;;  %v661_v41 = vpop.permute.xlu0 %660  ;;  %v755_v54 = vpack.c.bf16 %v672_v1, %v646_v42 }
 0x224   :  { %v663_v44 = vsel %vm662_vm11, %v659_v2, %v661_v41  ;;  %v666_v45 = vsel %vm662_vm11, %v661_v41, %v655_v25  ;;  %v560_v25 = vld [vmem:[#allocation7 + $0x40] sm:$0xff] }
 0x225   :  { %v674_v47 = vmul.f32 %v670_v37, %v663_v44  ;;  %v675_v49 = vmul.f32 %v671_v38, %v666_v45  ;;  %v603_v51 = vpop.permute.xlu1 %602  ;;  %v756_v53 = vpack.c.bf16 %v673_v40, %v647_v39 }
 0x227   :  { %v757_v55 = vpack.c.bf16 %v674_v47, %v648_v43  ;;  %v605_v57 = vpop.permute.xlu0 %604  ;;  %786 = vmatprep.subr.bf16.mxu0 %v756_v53  ;;  %v758_v58 = vpack.c.bf16 %v675_v49, %v649_v46 }
 0x228   :  { %v613_v59 = vsel %vm610_vm13, %v603_v51, %v605_v57  ;;  %787 = vmatpush1.bf16.msra.mxu0 %v755_v54  ;;  %v509_v54 = vld [vmem:[#allocation7 + $0x8] sm:$0xff] }
 0x229   :  { %827 = vmatprep.subr.bf16.mxu1 %v758_v58  ;;  %v607_v61 = vpop.permute.xlu1 %606  ;;  %v620_v62 = vmul.f32 %v616_v56, %v613_v59  ;;  %v535_v56 = vld [vmem:[#allocation7 + $0x28] sm:$0xff] }
 0x22a   :  { %v612_v63 = vsel %vm610_vm13, %v605_v57, %v607_v61  ;;  %828 = vmatpush1.bf16.msra.mxu1 %v757_v55 }
 0x22b   :  { %v621_v7 = vmul.f32 %v617_v60, %v612_v63  ;;  %v609_v9 = vpop.permute.xlu0 %608  ;;  %v751_v16 = vpack.c.bf16 %v620_v62, %v1231_v48  ;;  %v508_v60 = vld [vmem:[#allocation7] sm:$0xff]  ;;  %v536_v62 = vld [vmem:[#allocation7 + $0x30] sm:$0xff] }
 0x22c   :  { %v611_v10 = vsel %vm610_vm13, %v607_v61, %v609_v9  ;;  %v614_v11 = vsel %vm610_vm13, %v609_v9, %v603_v51 }
 0x22d   :  { %v622_v12 = vmul.f32 %v618_v5, %v611_v10  ;;  %v623_v13 = vmul.f32 %v619_v6, %v614_v11  ;;  %v547_v14 = vpop.permute.xlu1 %546  ;;  %v752_v15 = vpack.c.bf16 %v621_v7, %v1233_v50  ;;  %v587_v50 = vld [vmem:[#allocation7 + $0x68] sm:$0xff]  ;;  %v511_v5 = vld [vmem:[#allocation7 + $0x18] sm:$0xff]  ;;  %v534_v10 = vld [vmem:[#allocation7 + $0x20] sm:$0xff] }
 0x22e   :  { %v537_v11 = vld [vmem:[#allocation7 + $0x38] sm:$0xff] }
 0x22f   :  { %v753_v17 = vpack.c.bf16 %v622_v12, %v1236_v4  ;;  %v549_v18 = vpop.permute.xlu0 %548  ;;  %788 = vmatprep.subr.bf16.mxu0 %v752_v15  ;;  %v754_v19 = vpack.c.bf16 %v623_v13, %v1239_v52  ;;  %v510_v12 = vld [vmem:[#allocation7 + $0x10] sm:$0xff] }
 0x230   :  { %789 = vmatpush1.bf16.msra.mxu0 %v751_v16  ;;  %v557_v48 = vsel %vm554_vm14, %v547_v14, %v549_v18 }
 0x231   :  { %829 = vmatprep.subr.bf16.mxu1 %v754_v19  ;;  %v551_v20 = vpop.permute.xlu1 %550  ;;  %v565_v52 = vmul.f32 %v561_v23, %v557_v48 }
 0x232   :  { %830 = vmatpush1.bf16.msra.mxu1 %v753_v17  ;;  %v556_v2 = vsel %vm554_vm14, %v549_v18, %v551_v20 }
 0x233   :  { %v553_v21 = vpop.permute.xlu0 %552  ;;  %v566_v43 = vmul.f32 %v562_v34, %v556_v2 }
 0x234   :  { %v555_v30 = vsel %vm554_vm14, %v551_v20, %v553_v21  ;;  %v558_v31 = vsel %vm554_vm14, %v553_v21, %v547_v14 }
 0x235   :  { %v573_v22 = vpop.permute.xlu1 %572  ;;  %v564_v38 = vmul.f32 %v560_v25, %v558_v31  ;;  %v567_v39 = vmul.f32 %v563_v29, %v555_v30  ;;  %v446_v25 = vpop.f32.mrf.mxu1 }
 0x237   :  { %v575_v4 = vpop.permute.xlu0 %574 }
 0x238   :  { %v583_v24 = vsel %vm580_vm15, %v573_v22, %v575_v4 }
 0x239   :  { %v591_v26 = vmul.f32 %v587_v50, %v583_v24  ;;  %v577_v28 = vpop.permute.xlu1 %576  ;;  %v706_v24 = vld [vmem:[%s1364_s5] sm:$0xf]  ;;  %s1027_s5 = smov [#allocation9]  }
 0x23a   :  { %v582_v32 = vsel %vm580_vm15, %v575_v4, %v577_v28  ;;  %s898_s9 = sshll.u32 %s1027_s5, 4  ;;  %s899_s9 = int_to_ptr.vmem [resolvable:$true] %s898_s9 }
 0x23b   :  { %v579_v35 = vpop.permute.xlu0 %578  ;;  %v748_v0 = vpack.c.bf16 %v591_v26, %v565_v52  ;;  %v592_v1 = vmul.f32 %v588_v27, %v582_v32  ;;  %v405_v27 = vpop.f32.mrf.mxu0  ;;  %s981_s10 = scalar_lea.vmem %s899_s9, 512  ;;  %p986_p11 = scmp.lt.s32.totalorder %s899_s9, %s899_s9 }
 0x23c   :  { %v581_v36 = vsel %vm580_vm15, %v577_v28, %v579_v35  ;;  %v584_v37 = vsel %vm580_vm15, %v579_v35, %v573_v22  ;;  %v448_v28 = vpop.f32.mrf.mxu1  ;;  %p982_p10 = scmp.ne.s32.totalorder %s899_s9, %s981_s10  ;;  %p987_p12 = scmp.lt.s32.totalorder %s981_s10, %s981_s10 }
 0x23d   :  { %v590_v40 = vmul.f32 %v586_v33, %v584_v37  ;;  %v593_v41 = vmul.f32 %v589_v3, %v581_v36  ;;  %790 = vmatprep.subr.bf16.mxu0 %v748_v0  ;;  %v496_v42 = vpop.permute.xlu1 %495  ;;  %v749_v47 = vpack.c.bf16 %v592_v1, %v566_v43 }
 0x23e   :  { %p988_p13 = por %p987_p12, %p986_p11 }
 0x23f   :  { %v747_v44 = vpack.c.bf16 %v590_v40, %v564_v38  ;;  %v498_v45 = vpop.permute.xlu0 %497  ;;  %v750_v46 = vpack.c.bf16 %v593_v41, %v567_v39 }
 0x240   :  { %v506_v55 = vsel %vm503_vm0, %v496_v42, %v498_v45  ;;  %p989_p0 = pnand %p988_p13, %p982_p10 }
 0x241   :  { %791 = vmatpush1.bf16.msra.mxu0 %v747_v44  ;;  %831 = vmatprep.subr.bf16.mxu1 %v750_v46  ;;  %v500_v49 = vpop.permute.xlu1 %499  ;;  %v513_v59 = vmul.f32 %v509_v54, %v506_v55 }
 0x242   :  { %832 = vmatpush1.bf16.msra.mxu1 %v749_v47  ;;  %v505_v13 = vsel %vm503_vm0, %v498_v45, %v500_v49 }
 0x243   :  { %v502_v51 = vpop.permute.xlu0 %501  ;;  %v514_v23 = vmul.f32 %v510_v12, %v505_v13 }
 0x244   :  { %v504_v6 = vsel %vm503_vm0, %v500_v49, %v502_v51  ;;  %v507_v7 = vsel %vm503_vm0, %v502_v51, %v496_v42 }
 0x245   :  { %v521_v53 = vpop.permute.xlu1 %520  ;;  %v512_v19 = vmul.f32 %v508_v60, %v507_v7  ;;  %v515_v20 = vmul.f32 %v511_v5, %v504_v6 }
 0x247   :  { %v523_v57 = vpop.permute.xlu0 %522 }
 0x248   :  { %v531_v58 = vsel %vm528_vm1, %v521_v53, %v523_v57 }
 0x249   :  { %v539_v61 = vmul.f32 %v535_v56, %v531_v58  ;;  %v525_v63 = vpop.permute.xlu1 %524 }
 0x24a   :  { %v530_v9 = vsel %vm528_vm1, %v523_v57, %v525_v63 }
 0x24b   :  { %v527_v14 = vpop.permute.xlu0 %526  ;;  %v744_v15 = vpack.c.bf16 %v539_v61, %v513_v59  ;;  %v540_v16 = vmul.f32 %v536_v62, %v530_v9 }
 0x24c   :  { %v529_v17 = vsel %vm528_vm1, %v525_v63, %v527_v14  ;;  %v532_v18 = vsel %vm528_vm1, %v527_v14, %v521_v53 }
 0x24d   :  { %v538_v21 = vmul.f32 %v534_v10, %v532_v18  ;;  %v541_v22 = vmul.f32 %v537_v11, %v529_v17  ;;  %792 = vmatprep.subr.bf16.mxu0 %v744_v15  ;;  %v745_v4 = vpack.c.bf16 %v540_v16, %v514_v23 }
 0x24f   :  { %v743_v48 = vpack.c.bf16 %v538_v21, %v512_v19  ;;  %v746_v50 = vpack.c.bf16 %v541_v22, %v515_v20 }
 0x251   :  { %793 = vmatpush1.bf16.msra.mxu0 %v743_v48  ;;  %833 = vmatprep.subr.bf16.mxu1 %v746_v50 }
 0x252   :  { %834 = vmatpush1.bf16.msra.mxu1 %v745_v4 }
 0x254   :  { %914 = vmatmul.mubr.msk.bf16.vlgmr.msra.gmra.mxu0 %vm348_vm9, %v706_v24 }
 0x255   :  { %916 = vmatmul.mubr.msk.bf16.vlgmr.msra.gmra.mxu1 %vm348_vm9, %v706_v24 }
 0x256   :  { %v479_v52 = vpop.permute.xlu1 %478 }
 0x257   :  { %v481_v31 = vmul.f32 %v479_v52, %v403_v8  ;;  %v483_v3 = vmul.f32 %v479_v52, %v446_v25  ;;  %v482_v0 = vmul.f32 %v479_v52, %v405_v27  ;;  %v484_v39 = vmul.f32 %v479_v52, %v448_v28 }
 0x258   :  { %v864_v26 = vpop.permute.xlu0 %863 }
 0x25a   :  { %v489_v29 = vpop.permute.xlu1 %488 }
 0x25b   :  { %v491_v1 = vadd.f32 %v489_v29, %v481_v31  ;;  %v493_v40 = vadd.f32 %v489_v29, %v483_v3  ;;  %v492_v44 = vadd.f32 %v489_v29, %v482_v0  ;;  %v494_v49 = vadd.f32 %v489_v29, %v484_v39 }
 0x25c   :  { %v874_v34 = vpop.permute.xlu0 %873 }
 0x314   :  { %v812_v30 = vpop.f32.mrf.mxu0 }
 0x315   :  { %v866_v32 = vmul.f32 %v864_v26, %v812_v30  ;;  %v853_v33 = vpop.f32.mrf.mxu1 }
 0x316   :  { %v868_v2 = vmul.f32 %v864_v26, %v853_v33  ;;  %v814_v35 = vpop.f32.mrf.mxu0 }
 0x317   :  { %v876_v36 = vadd.f32 %v874_v34, %v866_v32  ;;  %v867_v37 = vmul.f32 %v864_v26, %v814_v35  ;;  %v855_v38 = vpop.f32.mrf.mxu1 }
 0x318   :  { %v878_v41 = vadd.f32 %v874_v34, %v868_v2  ;;  %v869_v42 = vmul.f32 %v864_v26, %v855_v38  ;;  %v816_v43 = vpop.f32.mrf.mxu0 }
 0x319   :  { %v880_v45 = vadd.f32 %v876_v36, %v491_v1  ;;  %v877_v46 = vadd.f32 %v874_v34, %v867_v37  ;;  %v857_v47 = vpop.f32.mrf.mxu1 }
 0x31a   :  { %v882_v51 = vadd.f32 %v878_v41, %v493_v40  ;;  %v879_v53 = vadd.f32 %v874_v34, %v869_v42  ;;  %v817_v54 = vpop.f32.mrf.mxu0 }
 0x31b   :  { %v884_v55 = vmax.f32 %v880_v45, 0.0  ;;  %v881_v56 = vadd.f32 %v877_v46, %v492_v44  ;;  %v858_v57 = vpop.f32.mrf.mxu1 }
 0x31c   :  { %v886_v58 = vmax.f32 %v882_v51, 0.0  ;;  %v883_v59 = vadd.f32 %v879_v53, %v494_v49 }
 0x31d   :  { %888 = vst [vmem:[#allocation9] sm:$0xff] %v884_v55  ;;  %v885_v60 = vmax.f32 %v881_v56, 0.0 }
 0x31e   :  { %890 = vst [vmem:[#allocation9 + $0x10] sm:$0xff] %v886_v58  ;;  %v887_v61 = vmax.f32 %v883_v59, 0.0 }
 0x31f   :  { %889 = vst [vmem:[#allocation9 + $0x8] sm:$0xff] %v885_v60 }
 0x320   :  { %891 = vst [vmem:[#allocation9 + $0x18] sm:$0xff] %v887_v61 }
 0x321   :  { %992 = shalt.err (!%p989_p0)
}
 0x322   :  { %901 = dma.vmem_to_hbm [thread:$0]  %s899_s9, 512, %s1370_s11, [#allocation6]  }
 0x323   :  { %1005 = dma.done.wait [#allocation6], 512  }
 0x324   :  { %1006 = vsyncadd [#allocation6], 4294966784 }
 0x325   :  { %905 = vsyncpa [#allocation5], 1 }
 0x326   :  { %906 = vsyncpa [#allocation8], 1 }
 0x327   :  { %907 = vsyncpa [#allocation6], 1 }

</bundles_post_ra>
